<compile_context>
chip_gen: v5e
topology: v5e:2x2
jax: 0.10.0
libtpu: 0.0.40
codegen_flags: <defaults>
</compile_context>

<pallas_src>
import functools

import jax
import jax.numpy as jnp
from jax.experimental import pallas as pl
from jax.experimental.pallas import tpu as pltpu

C1 = 0.01 ** 2
C2 = 0.03 ** 2


def _shift(a, shift, axis, *, use_roll):
    """result[i] = a[(i - shift) mod n] along `axis` (np.roll semantics)."""
    n = a.shape[axis]
    shift = shift % n
    if shift == 0:
        return a
    if use_roll:
        # XLU rotate: frees the vld/vst slots and removes the store->load dep.
        return pltpu.roll(a, shift=shift, axis=axis)
    # Fallback for non-tile-aligned extents: two static slices + concatenate.
    if axis == 0:
        return jnp.concatenate([a[n - shift:, :], a[:n - shift, :]], axis=0)
    return jnp.concatenate([a[:, n - shift:], a[:, :n - shift]], axis=1)


def _ssim_kernel(x_ref, y_ref, out_ref, *, H, W, k):
    # Block layout: (R, KW) with KW = k*W.  Sublane row s, lane l hold image
    # row r_img = s*k + l//W (within the block's planes) at column w = l % W.
    R, KW = out_ref.shape
    lanes_native = (KW % 128 == 0)
    rows_native = (R % 8 == 0)

    x = x_ref[...].astype(jnp.float32)
    y = y_ref[...].astype(jnp.float32)

    lane = jax.lax.broadcasted_iota(jnp.int32, (R, KW), 1)
    sub = jax.lax.broadcasted_iota(jnp.int32, (R, KW), 0)

    if k > 1:
        # k > 1 implies k*W == 128, hence W is a power of two.
        log2w = W.bit_length() - 1
        w_in_row = lane & (W - 1)
        grp = lane >> log2w
        r_img = sub * k + grp
        is_g0 = grp == 0          # first image row packed in this sublane row
        is_gl = grp == (k - 1)    # last image row packed in this sublane row
    else:
        w_in_row = lane
        r_img = sub

    if (H & (H - 1)) == 0:        # power-of-two fast path (no integer rem)
        row_in_plane = r_img & (H - 1)
    else:
        row_in_plane = r_img % H

    # Reflection masks (computed once, reused by all five pools).  Because
    # several planes are stacked along the row axis, "top"/"bottom" fire at
    # every plane seam, not just the block edge.
    is_top = row_in_plane == 0
    is_bot = row_in_plane == (H - 1)
    is_lft = w_in_row == 0
    is_rgt = w_in_row == (W - 1)

    inv9 = jnp.float32(1.0 / 9.0)

    def pool3(a):
        # Separable 3x3 average pool with ReflectionPad2d(1) semantics
        # (mirror without repeating the edge pixel).
        # --- horizontal 3-tap (within an image row) ---
        lf = _shift(a, 1, 1, use_roll=lanes_native)    # value at w-1 (wrapped at w==0)
        rt = _shift(a, -1, 1, use_roll=lanes_native)   # value at w+1 (wrapped at w==W-1)
        t = a + jnp.where(is_lft, rt, lf) + jnp.where(is_rgt, lf, rt)
        # --- vertical 3-tap (across image rows, reflect at plane top/bottom) ---
        if k > 1:
            up_l = _shift(t, W, 1, use_roll=lanes_native)      # prev row, same sublane
            up = jnp.where(is_g0, _shift(up_l, 1, 0, use_roll=rows_native), up_l)
            dn_l = _shift(t, -W, 1, use_roll=lanes_native)     # next row, same sublane
            dn = jnp.where(is_gl, _shift(dn_l, -1, 0, use_roll=rows_native), dn_l)
        else:
            up = _shift(t, 1, 0, use_roll=rows_native)
            dn = _shift(t, -1, 0, use_roll=rows_native)
        s = t + jnp.where(is_top, dn, up) + jnp.where(is_bot, up, dn)
        return s * inv9

    mu_x = pool3(x)
    mu_y = pool3(y)
    sigma_x = pool3(x * x) - mu_x * mu_x
    sigma_y = pool3(y * y) - mu_y * mu_y
    sigma_xy = pool3(x * y) - mu_x * mu_y

    ssim_n = (2.0 * mu_x * mu_y + C1) * (2.0 * sigma_xy + C2)
    ssim_d = (mu_x * mu_x + mu_y * mu_y + C1) * (sigma_x + sigma_y + C2)
    res = jnp.clip((1.0 - ssim_n / ssim_d) * 0.5, 0.0, 1.0)
    out_ref[...] = res.astype(out_ref.dtype)


def _choose_tiling(NC, H, W, itemsize):
    """Pick (lane-fold factor k, planes-per-block P, vmem_limit_bytes)."""
    # Lane-fold factor: make the lane axis exactly 128 wide when W < 128.
    if W % 128 == 0:
        k = 1
    elif 128 % W == 0 and (NC * H) % (128 // W) == 0:
        k = 128 // W
    else:
        k = 1  # TODO(synk): lane axis stays < 128-dense for widths like 416.

    # Generation-aware VMEM budget (128 MiB on v5e/v6e, 64 MiB on v7x).
    try:
        vmem_cap = int(pltpu.get_tpu_info().vmem_capacity_bytes)
    except Exception:
        vmem_cap = 64 * 1024 * 1024  # assume the smallest (v7x) part
    budget = max(8 << 20, min(vmem_cap // 3, 48 << 20))

    # Live bytes per plane per grid step: 2 inputs x 2 pipeline buffers + one
    # output x 2 buffers (caller dtype) + ~12 f32-sized temporaries.
    per_plane = H * W * (6 * itemsize + 12 * 4)

    shape_ok = []
    for P in range(1, NC + 1):
        if NC % P:
            continue
        if (P * H) % k:
            continue
        R = P * H // k
        if R % 8 != 0 and P != NC:   # blocks must be sublane-aligned unless full-extent
            continue
        shape_ok.append(P)
    fits = [P for P in shape_ok if P * per_plane <= budget]
    cands = fits if fits else [min(shape_ok)]
    # Keep >= 2 grid steps when possible so the "parallel" axis can shard
    # across v7x's two TensorCores and the pipeline has work to overlap.
    multi = [P for P in cands if NC // P >= 2]
    P = max(multi) if multi else max(cands)

    vmem_limit = int(min(vmem_cap * 3 // 4, 96 << 20))
    return k, P, vmem_limit


def ssim(x, y):
    """SSIM loss map (matches the PyTorch SSIM module).

    x, y: (N, C, H, W) arrays.  Returns (N, C, H, W) in x's dtype.
    """
    N, C, H, W = x.shape
    assert H >= 2 and W >= 2, "ReflectionPad2d(1) requires H, W >= 2"
    NC = N * C
    k, P, vmem_limit = _choose_tiling(NC, H, W, jnp.dtype(x.dtype).itemsize)

    rows = NC * H // k
    KW = k * W
    R = P * H // k

    # Free row-major reshapes: planes fold along sublanes and (when W < 128)
    # k consecutive image rows fold along lanes.  No reflection-pad HBM pass.
    x2 = x.reshape(rows, KW)
    y2 = y.reshape(rows, KW)

    out2 = pl.pallas_call(
        functools.partial(_ssim_kernel, H=H, W=W, k=k),
        out_shape=jax.ShapeDtypeStruct((rows, KW), x.dtype),
        grid=(NC // P,),
        in_specs=[
            pl.BlockSpec((R, KW), lambda i: (i, 0)),
            pl.BlockSpec((R, KW), lambda i: (i, 0)),
        ],
        out_specs=pl.BlockSpec((R, KW), lambda i: (i, 0)),
        compiler_params=pltpu.CompilerParams(
            dimension_semantics=("parallel",),
            vmem_limit_bytes=vmem_limit,
        ),
    )(x2, y2)

    return out2.reshape(N, C, H, W)


def _ssim_ref(x, y):
    """Pure-JAX reference (mirrors the PyTorch module) for validation."""
    def avgpool3(a):
        ap = jnp.pad(a, ((0, 0), (0, 0), (1, 1), (1, 1)), mode="reflect")
        H, W = a.shape[2], a.shape[3]
        s = jnp.zeros_like(a)
        for di in range(3):
            for dj in range(3):
                s = s + ap[:, :, di:di + H, dj:dj + W]
        return s / 9.0

    mu_x = avgpool3(x)
    mu_y = avgpool3(y)
    sigma_x = avgpool3(x * x) - mu_x ** 2
    sigma_y = avgpool3(y * y) - mu_y ** 2
    sigma_xy = avgpool3(x * y) - mu_x * mu_y
    n = (2 * mu_x * mu_y + C1) * (2 * sigma_xy + C2)
    d = (mu_x ** 2 + mu_y ** 2 + C1) * (sigma_x + sigma_y + C2)
    return jnp.clip((1 - n / d) / 2, 0.0, 1.0)


if __name__ == "__main__":
    key = jax.random.PRNGKey(0)
    kx, ky = jax.random.split(key)
    x = jax.random.uniform(kx, (2, 4, 16, 16), dtype=jnp.float32)
    y = jax.random.uniform(ky, (2, 4, 16, 16), dtype=jnp.float32)

    out = jax.block_until_ready(ssim(x, y))
    ref = _ssim_ref(x, y)

    assert out.shape == (2, 4, 16, 16)
    # The separable pool reassociates the 9-term window sums, so allow a little
    # f32 reassociation noise (amplified where the SSIM denominator is small).
    err = float(jnp.max(jnp.abs(out - ref)))
    assert err < 1e-4, err

    print("KERNEL_OK")
</pallas_src>

<mosaic_0001>
module attributes {stable_mosaic.version = 11 : i64} {
  func.func @_ssim_kernel(%arg0: i32, %arg1: memref<8x128xf32, #tpu.memory_space<vmem>>, %arg2: memref<8x128xf32, #tpu.memory_space<vmem>>, %arg3: memref<8x128xf32, #tpu.memory_space<vmem>>) attributes {dimension_semantics = [#tpu.dimension_semantics<parallel>], iteration_bounds = array<i64: 2>, scalar_prefetch = 0 : i64, scratch_operands = 0 : i64, tpu.core_type = #tpu.core_type<tc>, window_params = [{transform_indices = @transform_0, window_bounds = array<i64: 8, 128>}, {transform_indices = @transform_1, window_bounds = array<i64: 8, 128>}, {transform_indices = @transform_2, window_bounds = array<i64: 8, 128>}]} {
    %c0 = arith.constant 0 : index
    %c0_0 = arith.constant 0 : index
    %0 = vector.load %arg1[%c0, %c0_0] : memref<8x128xf32, #tpu.memory_space<vmem>>, vector<8x128xf32>
    %c0_1 = arith.constant 0 : index
    %c0_2 = arith.constant 0 : index
    %1 = vector.load %arg2[%c0_1, %c0_2] : memref<8x128xf32, #tpu.memory_space<vmem>>, vector<8x128xf32>
    %2 = tpu.iota {dimensions = array<i32: 1>} : vector<8x128xi32>
    %3 = tpu.iota {dimensions = array<i32: 0>} : vector<8x128xi32>
    %c15_i32 = arith.constant 15 : i32
    %4 = vector.broadcast %c15_i32 : i32 to vector<8x128xi32>
    %5 = arith.andi %2, %4 : vector<8x128xi32>
    %c4_i32 = arith.constant 4 : i32
    %6 = vector.broadcast %c4_i32 : i32 to vector<8x128xi32>
    %7 = arith.shrsi %2, %6 : vector<8x128xi32>
    %c8_i32 = arith.constant 8 : i32
    %8 = vector.broadcast %c8_i32 : i32 to vector<8x128xi32>
    %9 = arith.muli %3, %8 : vector<8x128xi32>
    %10 = arith.addi %9, %7 : vector<8x128xi32>
    %c0_i32 = arith.constant 0 : i32
    %11 = vector.broadcast %c0_i32 : i32 to vector<8x128xi32>
    %12 = arith.cmpi eq, %7, %11 : vector<8x128xi32>
    %c7_i32 = arith.constant 7 : i32
    %13 = vector.broadcast %c7_i32 : i32 to vector<8x128xi32>
    %14 = arith.cmpi eq, %7, %13 : vector<8x128xi32>
    %c15_i32_3 = arith.constant 15 : i32
    %15 = vector.broadcast %c15_i32_3 : i32 to vector<8x128xi32>
    %16 = arith.andi %10, %15 : vector<8x128xi32>
    %c0_i32_4 = arith.constant 0 : i32
    %17 = vector.broadcast %c0_i32_4 : i32 to vector<8x128xi32>
    %18 = arith.cmpi eq, %16, %17 : vector<8x128xi32>
    %c15_i32_5 = arith.constant 15 : i32
    %19 = vector.broadcast %c15_i32_5 : i32 to vector<8x128xi32>
    %20 = arith.cmpi eq, %16, %19 : vector<8x128xi32>
    %c0_i32_6 = arith.constant 0 : i32
    %21 = vector.broadcast %c0_i32_6 : i32 to vector<8x128xi32>
    %22 = arith.cmpi eq, %5, %21 : vector<8x128xi32>
    %c15_i32_7 = arith.constant 15 : i32
    %23 = vector.broadcast %c15_i32_7 : i32 to vector<8x128xi32>
    %24 = arith.cmpi eq, %5, %23 : vector<8x128xi32>
    %c1_i32 = arith.constant 1 : i32
    %25 = tpu.dynamic_rotate %0 by %c1_i32 dim 1 : vector<8x128xf32>, i32 -> vector<8x128xf32>
    %c127_i32 = arith.constant 127 : i32
    %26 = tpu.dynamic_rotate %0 by %c127_i32 dim 1 : vector<8x128xf32>, i32 -> vector<8x128xf32>
    %27 = arith.select %22, %26, %25 : vector<8x128xi1>, vector<8x128xf32>
    %28 = arith.addf %0, %27 : vector<8x128xf32>
    %29 = arith.select %24, %25, %26 : vector<8x128xi1>, vector<8x128xf32>
    %30 = arith.addf %28, %29 : vector<8x128xf32>
    %c16_i32 = arith.constant 16 : i32
    %31 = tpu.dynamic_rotate %30 by %c16_i32 dim 1 : vector<8x128xf32>, i32 -> vector<8x128xf32>
    %c1_i32_8 = arith.constant 1 : i32
    %32 = tpu.dynamic_rotate %31 by %c1_i32_8 dim 0 : vector<8x128xf32>, i32 -> vector<8x128xf32>
    %33 = arith.select %12, %32, %31 : vector<8x128xi1>, vector<8x128xf32>
    %c112_i32 = arith.constant 112 : i32
    %34 = tpu.dynamic_rotate %30 by %c112_i32 dim 1 : vector<8x128xf32>, i32 -> vector<8x128xf32>
    %c7_i32_9 = arith.constant 7 : i32
    %35 = tpu.dynamic_rotate %34 by %c7_i32_9 dim 0 : vector<8x128xf32>, i32 -> vector<8x128xf32>
    %36 = arith.select %14, %35, %34 : vector<8x128xi1>, vector<8x128xf32>
    %37 = arith.select %18, %36, %33 : vector<8x128xi1>, vector<8x128xf32>
    %38 = arith.addf %30, %37 : vector<8x128xf32>
    %39 = arith.select %20, %33, %36 : vector<8x128xi1>, vector<8x128xf32>
    %40 = arith.addf %38, %39 : vector<8x128xf32>
    %cst = arith.constant 0.111111112 : f32
    %41 = vector.broadcast %cst : f32 to vector<8x128xf32>
    %42 = arith.mulf %40, %41 : vector<8x128xf32>
    %c1_i32_10 = arith.constant 1 : i32
    %43 = tpu.dynamic_rotate %1 by %c1_i32_10 dim 1 : vector<8x128xf32>, i32 -> vector<8x128xf32>
    %c127_i32_11 = arith.constant 127 : i32
    %44 = tpu.dynamic_rotate %1 by %c127_i32_11 dim 1 : vector<8x128xf32>, i32 -> vector<8x128xf32>
    %45 = arith.select %22, %44, %43 : vector<8x128xi1>, vector<8x128xf32>
    %46 = arith.addf %1, %45 : vector<8x128xf32>
    %47 = arith.select %24, %43, %44 : vector<8x128xi1>, vector<8x128xf32>
    %48 = arith.addf %46, %47 : vector<8x128xf32>
    %c16_i32_12 = arith.constant 16 : i32
    %49 = tpu.dynamic_rotate %48 by %c16_i32_12 dim 1 : vector<8x128xf32>, i32 -> vector<8x128xf32>
    %c1_i32_13 = arith.constant 1 : i32
    %50 = tpu.dynamic_rotate %49 by %c1_i32_13 dim 0 : vector<8x128xf32>, i32 -> vector<8x128xf32>
    %51 = arith.select %12, %50, %49 : vector<8x128xi1>, vector<8x128xf32>
    %c112_i32_14 = arith.constant 112 : i32
    %52 = tpu.dynamic_rotate %48 by %c112_i32_14 dim 1 : vector<8x128xf32>, i32 -> vector<8x128xf32>
    %c7_i32_15 = arith.constant 7 : i32
    %53 = tpu.dynamic_rotate %52 by %c7_i32_15 dim 0 : vector<8x128xf32>, i32 -> vector<8x128xf32>
    %54 = arith.select %14, %53, %52 : vector<8x128xi1>, vector<8x128xf32>
    %55 = arith.select %18, %54, %51 : vector<8x128xi1>, vector<8x128xf32>
    %56 = arith.addf %48, %55 : vector<8x128xf32>
    %57 = arith.select %20, %51, %54 : vector<8x128xi1>, vector<8x128xf32>
    %58 = arith.addf %56, %57 : vector<8x128xf32>
    %cst_16 = arith.constant 0.111111112 : f32
    %59 = vector.broadcast %cst_16 : f32 to vector<8x128xf32>
    %60 = arith.mulf %58, %59 : vector<8x128xf32>
    %61 = arith.mulf %0, %0 : vector<8x128xf32>
    %c1_i32_17 = arith.constant 1 : i32
    %62 = tpu.dynamic_rotate %61 by %c1_i32_17 dim 1 : vector<8x128xf32>, i32 -> vector<8x128xf32>
    %c127_i32_18 = arith.constant 127 : i32
    %63 = tpu.dynamic_rotate %61 by %c127_i32_18 dim 1 : vector<8x128xf32>, i32 -> vector<8x128xf32>
    %64 = arith.select %22, %63, %62 : vector<8x128xi1>, vector<8x128xf32>
    %65 = arith.addf %61, %64 : vector<8x128xf32>
    %66 = arith.select %24, %62, %63 : vector<8x128xi1>, vector<8x128xf32>
    %67 = arith.addf %65, %66 : vector<8x128xf32>
    %c16_i32_19 = arith.constant 16 : i32
    %68 = tpu.dynamic_rotate %67 by %c16_i32_19 dim 1 : vector<8x128xf32>, i32 -> vector<8x128xf32>
    %c1_i32_20 = arith.constant 1 : i32
    %69 = tpu.dynamic_rotate %68 by %c1_i32_20 dim 0 : vector<8x128xf32>, i32 -> vector<8x128xf32>
    %70 = arith.select %12, %69, %68 : vector<8x128xi1>, vector<8x128xf32>
    %c112_i32_21 = arith.constant 112 : i32
    %71 = tpu.dynamic_rotate %67 by %c112_i32_21 dim 1 : vector<8x128xf32>, i32 -> vector<8x128xf32>
    %c7_i32_22 = arith.constant 7 : i32
    %72 = tpu.dynamic_rotate %71 by %c7_i32_22 dim 0 : vector<8x128xf32>, i32 -> vector<8x128xf32>
    %73 = arith.select %14, %72, %71 : vector<8x128xi1>, vector<8x128xf32>
    %74 = arith.select %18, %73, %70 : vector<8x128xi1>, vector<8x128xf32>
    %75 = arith.addf %67, %74 : vector<8x128xf32>
    %76 = arith.select %20, %70, %73 : vector<8x128xi1>, vector<8x128xf32>
    %77 = arith.addf %75, %76 : vector<8x128xf32>
    %cst_23 = arith.constant 0.111111112 : f32
    %78 = vector.broadcast %cst_23 : f32 to vector<8x128xf32>
    %79 = arith.mulf %77, %78 : vector<8x128xf32>
    %80 = arith.mulf %42, %42 : vector<8x128xf32>
    %81 = arith.subf %79, %80 : vector<8x128xf32>
    %82 = arith.mulf %1, %1 : vector<8x128xf32>
    %c1_i32_24 = arith.constant 1 : i32
    %83 = tpu.dynamic_rotate %82 by %c1_i32_24 dim 1 : vector<8x128xf32>, i32 -> vector<8x128xf32>
    %c127_i32_25 = arith.constant 127 : i32
    %84 = tpu.dynamic_rotate %82 by %c127_i32_25 dim 1 : vector<8x128xf32>, i32 -> vector<8x128xf32>
    %85 = arith.select %22, %84, %83 : vector<8x128xi1>, vector<8x128xf32>
    %86 = arith.addf %82, %85 : vector<8x128xf32>
    %87 = arith.select %24, %83, %84 : vector<8x128xi1>, vector<8x128xf32>
    %88 = arith.addf %86, %87 : vector<8x128xf32>
    %c16_i32_26 = arith.constant 16 : i32
    %89 = tpu.dynamic_rotate %88 by %c16_i32_26 dim 1 : vector<8x128xf32>, i32 -> vector<8x128xf32>
    %c1_i32_27 = arith.constant 1 : i32
    %90 = tpu.dynamic_rotate %89 by %c1_i32_27 dim 0 : vector<8x128xf32>, i32 -> vector<8x128xf32>
    %91 = arith.select %12, %90, %89 : vector<8x128xi1>, vector<8x128xf32>
    %c112_i32_28 = arith.constant 112 : i32
    %92 = tpu.dynamic_rotate %88 by %c112_i32_28 dim 1 : vector<8x128xf32>, i32 -> vector<8x128xf32>
    %c7_i32_29 = arith.constant 7 : i32
    %93 = tpu.dynamic_rotate %92 by %c7_i32_29 dim 0 : vector<8x128xf32>, i32 -> vector<8x128xf32>
    %94 = arith.select %14, %93, %92 : vector<8x128xi1>, vector<8x128xf32>
    %95 = arith.select %18, %94, %91 : vector<8x128xi1>, vector<8x128xf32>
    %96 = arith.addf %88, %95 : vector<8x128xf32>
    %97 = arith.select %20, %91, %94 : vector<8x128xi1>, vector<8x128xf32>
    %98 = arith.addf %96, %97 : vector<8x128xf32>
    %cst_30 = arith.constant 0.111111112 : f32
    %99 = vector.broadcast %cst_30 : f32 to vector<8x128xf32>
    %100 = arith.mulf %98, %99 : vector<8x128xf32>
    %101 = arith.mulf %60, %60 : vector<8x128xf32>
    %102 = arith.subf %100, %101 : vector<8x128xf32>
    %103 = arith.mulf %0, %1 : vector<8x128xf32>
    %c1_i32_31 = arith.constant 1 : i32
    %104 = tpu.dynamic_rotate %103 by %c1_i32_31 dim 1 : vector<8x128xf32>, i32 -> vector<8x128xf32>
    %c127_i32_32 = arith.constant 127 : i32
    %105 = tpu.dynamic_rotate %103 by %c127_i32_32 dim 1 : vector<8x128xf32>, i32 -> vector<8x128xf32>
    %106 = arith.select %22, %105, %104 : vector<8x128xi1>, vector<8x128xf32>
    %107 = arith.addf %103, %106 : vector<8x128xf32>
    %108 = arith.select %24, %104, %105 : vector<8x128xi1>, vector<8x128xf32>
    %109 = arith.addf %107, %108 : vector<8x128xf32>
    %c16_i32_33 = arith.constant 16 : i32
    %110 = tpu.dynamic_rotate %109 by %c16_i32_33 dim 1 : vector<8x128xf32>, i32 -> vector<8x128xf32>
    %c1_i32_34 = arith.constant 1 : i32
    %111 = tpu.dynamic_rotate %110 by %c1_i32_34 dim 0 : vector<8x128xf32>, i32 -> vector<8x128xf32>
    %112 = arith.select %12, %111, %110 : vector<8x128xi1>, vector<8x128xf32>
    %c112_i32_35 = arith.constant 112 : i32
    %113 = tpu.dynamic_rotate %109 by %c112_i32_35 dim 1 : vector<8x128xf32>, i32 -> vector<8x128xf32>
    %c7_i32_36 = arith.constant 7 : i32
    %114 = tpu.dynamic_rotate %113 by %c7_i32_36 dim 0 : vector<8x128xf32>, i32 -> vector<8x128xf32>
    %115 = arith.select %14, %114, %113 : vector<8x128xi1>, vector<8x128xf32>
    %116 = arith.select %18, %115, %112 : vector<8x128xi1>, vector<8x128xf32>
    %117 = arith.addf %109, %116 : vector<8x128xf32>
    %118 = arith.select %20, %112, %115 : vector<8x128xi1>, vector<8x128xf32>
    %119 = arith.addf %117, %118 : vector<8x128xf32>
    %cst_37 = arith.constant 0.111111112 : f32
    %120 = vector.broadcast %cst_37 : f32 to vector<8x128xf32>
    %121 = arith.mulf %119, %120 : vector<8x128xf32>
    %122 = arith.mulf %42, %60 : vector<8x128xf32>
    %123 = arith.subf %121, %122 : vector<8x128xf32>
    %cst_38 = arith.constant 2.000000e+00 : f32
    %124 = vector.broadcast %cst_38 : f32 to vector<8x128xf32>
    %125 = arith.mulf %124, %42 : vector<8x128xf32>
    %126 = arith.mulf %125, %60 : vector<8x128xf32>
    %cst_39 = arith.constant 9.99999974E-5 : f32
    %127 = vector.broadcast %cst_39 : f32 to vector<8x128xf32>
    %128 = arith.addf %126, %127 : vector<8x128xf32>
    %cst_40 = arith.constant 2.000000e+00 : f32
    %129 = vector.broadcast %cst_40 : f32 to vector<8x128xf32>
    %130 = arith.mulf %129, %123 : vector<8x128xf32>
    %cst_41 = arith.constant 8.99999984E-4 : f32
    %131 = vector.broadcast %cst_41 : f32 to vector<8x128xf32>
    %132 = arith.addf %130, %131 : vector<8x128xf32>
    %133 = arith.mulf %128, %132 : vector<8x128xf32>
    %134 = arith.mulf %42, %42 : vector<8x128xf32>
    %135 = arith.mulf %60, %60 : vector<8x128xf32>
    %136 = arith.addf %134, %135 : vector<8x128xf32>
    %cst_42 = arith.constant 9.99999974E-5 : f32
    %137 = vector.broadcast %cst_42 : f32 to vector<8x128xf32>
    %138 = arith.addf %136, %137 : vector<8x128xf32>
    %139 = arith.addf %81, %102 : vector<8x128xf32>
    %cst_43 = arith.constant 8.99999984E-4 : f32
    %140 = vector.broadcast %cst_43 : f32 to vector<8x128xf32>
    %141 = arith.addf %139, %140 : vector<8x128xf32>
    %142 = arith.mulf %138, %141 : vector<8x128xf32>
    %143 = arith.divf %133, %142 : vector<8x128xf32>
    %cst_44 = arith.constant 1.000000e+00 : f32
    %144 = vector.broadcast %cst_44 : f32 to vector<8x128xf32>
    %145 = arith.subf %144, %143 : vector<8x128xf32>
    %cst_45 = arith.constant 5.000000e-01 : f32
    %146 = vector.broadcast %cst_45 : f32 to vector<8x128xf32>
    %147 = arith.mulf %145, %146 : vector<8x128xf32>
    %cst_46 = arith.constant 0.000000e+00 : f32
    %cst_47 = arith.constant 1.000000e+00 : f32
    %148 = vector.broadcast %cst_46 : f32 to vector<8x128xf32>
    %149 = arith.maximumf %148, %147 : vector<8x128xf32>
    %150 = vector.broadcast %cst_47 : f32 to vector<8x128xf32>
    %151 = arith.minimumf %150, %149 : vector<8x128xf32>
    %c0_48 = arith.constant 0 : index
    %c0_49 = arith.constant 0 : index
    %152 = vector.load %arg3[%c0_48, %c0_49] : memref<8x128xf32, #tpu.memory_space<vmem>>, vector<8x128xf32>
    tpu.vector_store %arg3[%c0_48, %c0_49], %151 {strides = array<i32>} : memref<8x128xf32, #tpu.memory_space<vmem>>, vector<8x128xf32>,
    return
  }
  func.func @transform_0(%arg0: i32) -> (i32, i32) {
    %c0_i32 = arith.constant 0 : i32
    %c0_i32_0 = arith.constant 0 : i32
    return %arg0, %c0_i32 : i32, i32
  }
  func.func @transform_1(%arg0: i32) -> (i32, i32) {
    %c0_i32 = arith.constant 0 : i32
    %c0_i32_0 = arith.constant 0 : i32
    return %arg0, %c0_i32 : i32, i32
  }
  func.func @transform_2(%arg0: i32) -> (i32, i32) {
    %c0_i32 = arith.constant 0 : i32
    %c0_i32_0 = arith.constant 0 : i32
    return %arg0, %c0_i32 : i32, i32
  }
}

</mosaic_0001>

<bundles_post_ra>
// kernel: tpu_custom_call.1
= control target key start
LH: loop header
LB: loop body
LE: loop exit
PB: predicated region body
PF: predicated region fallthrough
CT: control target
= control target key end

     0   :  { %7 = vsyncpa [#allocation3], 0  ;;  %s930_s0 = inlined_call_operand.hbm [shape: f32[16,128], index: 0, kind: input, shape index: {}]   ;;  %s931_s1 = inlined_call_operand.hbm [shape: f32[16,128], index: 1, kind: input, shape index: {}]   ;;  %s932_s2 = inlined_call_operand.hbm [shape: f32[16,128], index: 2, kind: output, shape index: {}]  }
   0x1   :  { %9 = vsyncpa [#allocation3 + $0x1], 0 }
   0x2   :  { %10 = vsyncpa [#allocation6], 0 }
   0x3   :  { %12 = vsyncpa [#allocation6 + $0x1], 0 }
   0x4   :  { %13 = vsyncpa [#allocation4], 0 }
   0x5   :  { %15 = vsyncpa [#allocation4 + $0x1], 0  ;;  %s694_s9 = smov 0   ;;  %s696_s10 = smov 0  }
   0x6   :  { %s698_s11 = smov 0   ;;  %s700_s12 = smov 0  }
   0x7 LB: > { %s715_s13 = sadd.s32 4294967295, %s673_s12   ;;  %s471_s14 = sadd.s32 4294967294, %s673_s12   ;;  %s673_s12 = sphi %s700_s12, %s951_s12   ;;  %s669_s11 = sphi %s698_s11, %s950_s11   ;;  %s665_s10 = sphi %s696_s10, %s949_s10   ;;  %s661_s9 = sphi %s694_s9, %s948_s9  }
   0x8   : > { %s719_s15 = sadd.s32 1, %s673_s12   ;;  %s28_s16 = sadd.s32 1, %s669_s11 }
   0x9   : > { %s25_s17 = ssub.s32 %s673_s12, %s719_s15  ;;  %p35_p0 = scmp.ne.s32.totalorder %s669_s11, %s665_s10 }
   0xa   : > { %p26_p1 = scmp.eq.s32.totalorder %s25_s17, 0  ;;  %p36_p2 = scmp.eq.s32.totalorder %s673_s12, 0 }
   0xb   : > { %p41_p3 = scmp.ne.s32.totalorder %s665_s10, %s661_s9  ;;  %p42_p4 = scmp.eq.s32.totalorder %s715_s13, 0 }
   0xc   : > { %s731_s18 = scalar_select %p26_p1, %s669_s11, %s28_s16  }
   0xd   : > { %p733_p5 = por %p36_p2, %p35_p0  ;;  %p737_p6 = por %p42_p4, %p41_p3 }
   0xe   : > { %p91_p7 = scmp.eq.s32.totalorder %s715_s13, 1  ;;  %p97_p8 = scmp.eq.s32.totalorder %s471_s14, 1 }
   0xf   : > { %p503_p10 = scmp.lt.s32.totalorder %s673_s12, 2  ;;  %s753_s23 = sand.u32 1, %s669_s11  }
  0x10   : > { %p744_p11 = por %p91_p7, %p35_p0  ;;  %p748_p12 = por %p97_p8, %p41_p3 }
  0x11   : > { %s475_s24 = sshll.u32 %s673_s12, 3  ;;  %s474_s25 = sshll.u32 %s753_s23, 3 }
  0x12   : > { %s125_s28 = scalar_lea.hbm %s930_s0, %s475_s24  ;;  %s121_s30 = scalar_lea.vmem [#allocation2], %s474_s25 }
  0x13   : > { %s127_s29 = sshll.u32 %s125_s28, 4  ;;  %s129_s3 = sshll.u32 %s121_s30, 4  ;;  %s128_s29 = int_to_ptr.hbm [resolvable:$true] %s127_s29  ;;  %s130_s3 = int_to_ptr.vmem [resolvable:$true] %s129_s3 }
  0x14   : > { %p762_p13 = pnand %p503_p10, %p733_p5  ;;  %p478_p0 = scmp.ge.s32.totalorder %s673_s12, 1 }
  0x15   : > { %p153_p1 = scmp.lt.s32.totalorder %s673_s12, 3  ;;  %s118_s5 = scalar_lea.sflag [#allocation3], %s753_s23 }
  0x16   : > { %s543_s6 = sshra.s32 %s128_s29, 4  ;;  %p547_p3 = pneg %p762_p13  ;;  %s544_s6 = int_to_ptr.hbm [resolvable:$true] %s543_s6 }
  0x17   : > { %s545_s7 = scalar_lea.hbm %s544_s6, 8  ;;  %s550_s16 = scalar_lea.hbm %s930_s0, 16 }
  0x18   : > { %p546_p2 = scmp.ne.s32.totalorder %s544_s6, %s545_s7  ;;  %p551_p5 = scmp.lt.s32.totalorder %s544_s6, %s930_s0 }
  0x19   : > { %p552_p8 = scmp.lt.s32.totalorder %s550_s16, %s545_s7 }
  0x1a   : > { %p548_p4 = pnand %p547_p3, %p546_p2 }
  0x1b   : > { %p553_p10 = por %p552_p8, %p551_p5 }
  0x1c   : > { %p549_p7 = pneg %p548_p4 }
  0x1e   : > { %p554_p9 = pnand %p553_p10, %p549_p7 }
  0x20   : > { %557 = shalt.err (!%p554_p9)
}
  0x21   : > { %495 = dma.hbm_to_vmem [thread:$0]  (!%p762_p13), %s128_s29, 128, %s130_s3, %s118_s5  }
  0x22   : > { %p786_p2 = pnand %p478_p0, %p153_p1  ;;  %s144_s30 = scalar_lea.hbm %s931_s1, %s475_s24 }
  0x23   : > { %s146_s6 = sshll.u32 %s144_s30, 4  ;;  %s140_s7 = scalar_lea.vmem [#allocation5], %s474_s25  ;;  %s147_s6 = int_to_ptr.hbm [resolvable:$true] %s146_s6 }
  0x24   : > { %s148_s8 = sshll.u32 %s140_s7, 4  ;;  %s137_s14 = scalar_lea.sflag [#allocation6], %s753_s23  ;;  %s149_s8 = int_to_ptr.vmem [resolvable:$true] %s148_s8 }
  0x25   : > { %s573_s16 = sshra.s32 %s147_s6, 4  ;;  %s580_s5 = scalar_lea.hbm %s931_s1, 16  ;;  %s574_s16 = int_to_ptr.hbm [resolvable:$true] %s573_s16 }
  0x26   : > { %s575_s17 = scalar_lea.hbm %s574_s16, 8  ;;  %p581_p4 = scmp.lt.s32.totalorder %s574_s16, %s931_s1 }
  0x27   : > { %p576_p9 = scmp.ne.s32.totalorder %s574_s16, %s575_s17  ;;  %p582_p7 = scmp.lt.s32.totalorder %s580_s5, %s575_s17 }
  0x29   : > { %p578_p0 = pnand %p576_p9, %p547_p3  ;;  %p583_p5 = por %p582_p7, %p581_p4 }
  0x2b   : > { %p579_p1 = pneg %p578_p0 }
  0x2d   : > { %p584_p8 = pnand %p583_p5, %p579_p1 }
  0x2f   : > { %587 = shalt.err (!%p584_p8)
}
  0x30   : > { %498 = dma.hbm_to_vmem [thread:$0]  (!%p762_p13), %s147_s6, 128, %s149_s8, %s137_s14  }
  0x31   : > { %157 = sbr.rel (%p786_p2) target bundleno = 365 (0x16d), region = 28  ;;  %s808_s23 = sand.u32 (!%p786_p2), 1, %s665_s10  }
  0x32   : > { %s811_s25 = sshll.u32 (!%p786_p2), %s808_s23, 3  ;;  %s160_s27 = scalar_lea.sflag (!%p786_p2), [#allocation3], %s808_s23 }
  0x33   : > { %s163_s28 = scalar_lea.vmem (!%p786_p2), [#allocation2], %s811_s25 }
  0x36   : > { %648 = dma.done.wait (%p737_p6), %s160_s27, 128  }
  0x37   : > { %650 = vsyncadd (%p737_p6), %s160_s27, 4294967168  ;;  %s170_s4 = scalar_lea.sflag [#allocation6], %s808_s23  ;;  %s173_s26 = scalar_lea.vmem [#allocation5], %s811_s25 }
  0x38   : > { %652 = dma.done.wait (%p737_p6), %s170_s4, 128  }
  0x39   : > { %654 = vsyncadd (%p737_p6), %s170_s4, 4294967168  ;;  %v201_v0 = vld [vmem:[%s173_s26] sm:$0xff]  ;;  %v200_v1 = vld [vmem:[%s163_s28] sm:$0xff]  ;;  %s675_s30 = smov 1   ;;  %s676_s6 = smov 127   ;;  %v202_v5 = vlaneseq }
  0x3a   : > { %238 = vrot.lane.b32.xlu1 %v201_v0, %s675_s30  ;;  %217 = vrot.lane.b32.xlu0 %v200_v1, %s675_s30  ;;  %v259_v2 = vmul.f32 %v200_v1, %v200_v1  ;;  %v283_v3 = vmul.f32 %v201_v0, %v201_v0  ;;  %v307_v4 = vmul.f32 %v201_v0, %v200_v1  ;;  %s677_s20 = smov 16   ;;  %s678_s7 = smov 112  }
  0x3b   : > { %v203_v6 = vand.u32 127, %v202_v5  ;;  %v205_v40 = vshrl.u32 %v202_v5, 7  ;;  %s483_s8 = sshll.u32 %s715_s13, 3  ;;  %s199_s29 = scalar_lea.vmem [#allocation7], %s811_s25 }
  0x3c   : > { %260 = vrot.lane.b32.xlu2 %v259_v2, %s675_s30  ;;  %s373_s17 = scalar_lea.hbm %s932_s2, %s483_s8  ;;  %s375_s3 = sshll.u32 %s199_s29, 4  ;;  %s376_s3 = int_to_ptr.vmem [resolvable:$true] %s375_s3 }
  0x3d   : > { %v206_v10 = vand.u32 15, %v203_v6  ;;  %v208_v42 = vmul.u32 8, %v205_v40  ;;  %v207_v43 = vshra.s32 %v203_v6, 4  ;;  %s377_s5 = sshll.u32 %s373_s17, 4  ;;  %s363_s19 = scalar_lea.sflag [#allocation4], %s808_s23  ;;  %s378_s5 = int_to_ptr.hbm [resolvable:$true] %s377_s5 }
  0x3e   : > { %s617_s24 = sshra.s32 %s378_s5, 4  ;;  %s623_s4 = scalar_lea.hbm %s932_s2, 16  ;;  %s618_s24 = int_to_ptr.hbm [resolvable:$true] %s617_s24 }
  0x3f   : > { %vm825_vm0 = vcmp.eq.s32.totalorder %v206_v10, 0  ;;  %vm829_vm1 = vcmp.eq.s32.totalorder %v206_v10, 15  ;;  %v209_v44 = vadd.s32 %v208_v42, %v207_v43  ;;  %vm211_vm2 = vcmp.eq.s32.totalorder %v207_v43, 7  ;;  %s619_s13 = scalar_lea.hbm %s618_s24, 8  ;;  %p624_p10 = scmp.lt.s32.totalorder %s618_s24, %s932_s2 }
  0x40   : > { %vm210_vm3 = vcmp.eq.s32.totalorder %v207_v43, 0  ;;  %p620_p6 = scmp.ne.s32.totalorder %s618_s24, %s619_s13  ;;  %p625_p2 = scmp.lt.s32.totalorder %s623_s4, %s619_s13 }
  0x41   : > { %v212_v48 = vand.u32 15, %v209_v44 }
  0x42   : > { %240 = vrot.lane.b32.xlu1 %v201_v0, %s676_s6  ;;  %219 = vrot.lane.b32.xlu0 %v200_v1, %s676_s6  ;;  %p621_p13 = pnand %p620_p6, %p744_p11  ;;  %p626_p9 = por %p625_p2, %p624_p10 }
  0x43   : > { %vm857_vm4 = vcmp.eq.s32.totalorder %v212_v48, 0  ;;  %vm873_vm5 = vcmp.eq.s32.totalorder %v212_v48, 15 }
  0x44   : > { %262 = vrot.lane.b32.xlu2 %v259_v2, %s676_s6  ;;  %p622_p3 = pneg %p621_p13 }
  0x46   : > { %p627_p0 = pnand %p626_p9, %p622_p3 }
  0x4a   : > { %286 = vrot.lane.b32.xlu1 %v283_v3, %s676_s6  ;;  %284 = vrot.lane.b32.xlu0 %v283_v3, %s675_s30 }
  0x4c   : > { %308 = vrot.lane.b32.xlu2 %v307_v4, %s675_s30 }
  0x52   : > { %310 = vrot.lane.b32.xlu0 %v307_v4, %s676_s6 }
  0x96   : > { %v261_v7 = vpop.permute.xlu2 %260 }
  0x9e   : > { %v263_v19 = vpop.permute.xlu2 %262 }
  0x9f   : > { %v264_v24 = vsel %vm825_vm0, %v263_v19, %v261_v7  ;;  %v266_v27 = vsel %vm829_vm1, %v261_v7, %v263_v19 }
  0xa0   : > { %v265_v25 = vadd.f32 %v264_v24, %v259_v2 }
  0xa2   : > { %v267_v29 = vadd.f32 %v266_v27, %v265_v25 }
  0xa6   : > { %v309_v31 = vpop.permute.xlu2 %308 }
  0xac   : > { %v239_v8 = vpop.permute.xlu1 %238  ;;  %v218_v9 = vpop.permute.xlu0 %217 }
  0xb4   : > { %v241_v13 = vpop.permute.xlu1 %240  ;;  %v220_v14 = vpop.permute.xlu0 %219 }
  0xb5   : > { %v242_v15 = vsel %vm825_vm0, %v241_v13, %v239_v8  ;;  %v221_v16 = vsel %vm825_vm0, %v220_v14, %v218_v9  ;;  %v244_v20 = vsel %vm829_vm1, %v239_v8, %v241_v13  ;;  %v223_v21 = vsel %vm829_vm1, %v218_v9, %v220_v14 }
  0xb6   : > { %v243_v17 = vadd.f32 %v242_v15, %v201_v0  ;;  %v222_v18 = vadd.f32 %v221_v16, %v200_v1 }
  0xb8   : > { %v245_v22 = vadd.f32 %v244_v20, %v243_v17  ;;  %v224_v23 = vadd.f32 %v223_v21, %v222_v18 }
  0xba   : > { %225 = vrot.lane.b32.xlu1 %v224_v23, %s677_s20  ;;  %246 = vrot.lane.b32.xlu0 %v245_v22, %s677_s20 }
  0xbb   : > { %229 = vrot.lane.b32.xlu2 %v224_v23, %s678_s7 }
  0xbc   : > { %v285_v26 = vpop.permute.xlu0 %284  ;;  %v287_v28 = vpop.permute.xlu1 %286 }
  0xbd   : > { %v288_v30 = vsel %vm825_vm0, %v287_v28, %v285_v26  ;;  %v290_v34 = vsel %vm829_vm1, %v285_v26, %v287_v28 }
  0xbe   : > { %v289_v32 = vadd.f32 %v288_v30, %v283_v3 }
  0xc0   : > { %v291_v38 = vadd.f32 %v290_v34, %v289_v32 }
  0xc2   : > { %250 = vrot.lane.b32.xlu1 %v245_v22, %s678_s7  ;;  %272 = vrot.lane.b32.xlu0 %v267_v29, %s678_s7 }
  0xc3   : > { %268 = vrot.lane.b32.xlu2 %v267_v29, %s677_s20 }
  0xc4   : > { %v311_v33 = vpop.permute.xlu0 %310 }
  0xc5   : > { %v312_v35 = vsel %vm825_vm0, %v311_v33, %v309_v31  ;;  %v314_v36 = vsel %vm829_vm1, %v309_v31, %v311_v33 }
  0xc6   : > { %v313_v37 = vadd.f32 %v312_v35, %v307_v4 }
  0xc8   : > { %v853_v39 = vadd.f32 %v314_v36, %v313_v37 }
  0xca   : > { %292 = vrot.lane.b32.xlu1 %v291_v38, %s677_s20  ;;  %316 = vrot.lane.b32.xlu0 %v853_v39, %s677_s20 }
  0xcb   : > { %296 = vrot.lane.b32.xlu2 %v291_v38, %s678_s7 }
  0xd2   : > { %320 = vrot.lane.b32.xlu1 %v853_v39, %s678_s7 }
 0x115   : > { %v230_v41 = vpop.permute.xlu2 %229 }
 0x116   : > { %v231_v50 = vrot.slane %v230_v41, 1 }
 0x118   : > { %v232_v57 = vsel %vm211_vm2, %v231_v50, %v230_v41 }
 0x11d   : > { %v269_v47 = vpop.permute.xlu2 %268 }
 0x11e   : > { %v270_v51 = vrot.slane %v269_v47, 7 }
 0x120   : > { %v271_v61 = vsel %vm210_vm3, %v270_v51, %v269_v47 }
 0x125   : > { %v297_v1 = vpop.permute.xlu2 %296 }
 0x126   : > { %v298_v8 = vrot.slane %v297_v1, 1 }
 0x128   : > { %v299_v17 = vsel %vm211_vm2, %v298_v8, %v297_v1 }
 0x12c   : > { %v226_v45 = vpop.permute.xlu1 %225  ;;  %v247_v46 = vpop.permute.xlu0 %246 }
 0x12d   : > { %v227_v49 = vrot.slane %v226_v45, 7  ;;  %v248_v54 = vrot.slane %v247_v46, 7 }
 0x12f   : > { %v228_v53 = vsel %vm210_vm3, %v227_v49, %v226_v45  ;;  %v249_v62 = vsel %vm210_vm3, %v248_v54, %v247_v46 }
 0x130   : > { %v233_v60 = vsel %vm857_vm4, %v232_v57, %v228_v53  ;;  %v235_v11 = vsel %vm873_vm5, %v228_v53, %v232_v57 }
 0x131   : > { %v234_v5 = vadd.f32 %v233_v60, %v224_v23 }
 0x133   : > { %v236_v13 = vadd.f32 %v235_v11, %v234_v5 }
 0x134   : > { %v251_v55 = vpop.permute.xlu1 %250  ;;  %v273_v56 = vpop.permute.xlu0 %272 }
 0x135   : > { %v252_v58 = vrot.slane %v251_v55, 1  ;;  %v274_v59 = vrot.slane %v273_v56, 1 }
 0x137   : > { %v253_v63 = vsel %vm211_vm2, %v252_v58, %v251_v55  ;;  %v275_v0 = vsel %vm211_vm2, %v274_v59, %v273_v56 }
 0x138   : > { %v254_v2 = vsel %vm857_vm4, %v253_v63, %v249_v62  ;;  %v276_v3 = vsel %vm857_vm4, %v275_v0, %v271_v61  ;;  %v256_v7 = vsel %vm873_vm5, %v249_v62, %v253_v63  ;;  %v278_v15 = vsel %vm873_vm5, %v271_v61, %v275_v0 }
 0x139   : > { %v255_v6 = vadd.f32 %v254_v2, %v245_v22  ;;  %v277_v10 = vadd.f32 %v276_v3, %v267_v29  ;;  %v237_v22 = vmul.f32 0.11111111, %v236_v13 }
 0x13b   : > { %v257_v9 = vadd.f32 %v256_v7, %v255_v6  ;;  %v279_v19 = vadd.f32 %v278_v15, %v277_v10  ;;  %v281_v30 = vmul.f32 %v237_v22, %v237_v22  ;;  %v331_v43 = vmul.f32 2.0, %v237_v22 }
 0x13c   : > { %v293_v12 = vpop.permute.xlu1 %292  ;;  %v317_v16 = vpop.permute.xlu0 %316 }
 0x13d   : > { %v294_v14 = vrot.slane %v293_v12, 7  ;;  %v258_v18 = vmul.f32 0.11111111, %v257_v9  ;;  %v318_v24 = vrot.slane %v317_v16, 7  ;;  %v280_v26 = vmul.f32 0.11111111, %v279_v19 }
 0x13f   : > { %v295_v20 = vsel %vm210_vm3, %v294_v14, %v293_v12  ;;  %v305_v28 = vmul.f32 %v258_v18, %v258_v18  ;;  %v319_v33 = vsel %vm210_vm3, %v318_v24, %v317_v16  ;;  %v282_v34 = vsub.f32 %v280_v26, %v281_v30 }
 0x140   : > { %v300_v21 = vsel %vm857_vm4, %v299_v17, %v295_v20  ;;  %v302_v25 = vsel %vm873_vm5, %v295_v20, %v299_v17  ;;  %v329_v49 = vmul.f32 %v258_v18, %v237_v22  ;;  %v332_v52 = vmul.f32 %v331_v43, %v258_v18 }
 0x141   : > { %v301_v23 = vadd.f32 %v300_v21, %v291_v38  ;;  %v337_v36 = vadd.f32 %v305_v28, %v281_v30 }
 0x142   : > { %v333_v59 = vadd.f32 0.0001, %v332_v52 }
 0x143   : > { %v303_v27 = vadd.f32 %v302_v25, %v301_v23  ;;  %v338_v44 = vadd.f32 0.0001, %v337_v36 }
 0x144   : > { %v321_v29 = vpop.permute.xlu1 %320 }
 0x145   : > { %v304_v31 = vmul.f32 0.11111111, %v303_v27  ;;  %v322_v32 = vrot.slane %v321_v29, 1 }
 0x147   : > { %v306_v35 = vsub.f32 %v304_v31, %v305_v28  ;;  %v323_v37 = vsel %vm211_vm2, %v322_v32, %v321_v29 }
 0x148   : > { %v324_v38 = vsel %vm857_vm4, %v323_v37, %v319_v33  ;;  %v326_v40 = vsel %vm873_vm5, %v319_v33, %v323_v37 }
 0x149   : > { %v339_v41 = vadd.f32 %v306_v35, %v282_v34  ;;  %v325_v42 = vadd.f32 %v324_v38, %v853_v39 }
 0x14b   : > { %v340_v45 = vadd.f32 0.0009, %v339_v41  ;;  %v327_v46 = vadd.f32 %v326_v40, %v325_v42 }
 0x14d   : > { %v341_v47 = vmul.f32 %v340_v45, %v338_v44  ;;  %v328_v48 = vmul.f32 0.11111111, %v327_v46 }
 0x14f   : > { %541 = vrcp.f32 %v341_v47  ;;  %v330_v50 = vsub.f32 %v328_v48, %v329_v49  ;;  %v353_v56 = vand.u32 2147483648, %v341_v47  ;;  %v351_v39 = vand.u32 2147483647, %v341_v47 }
 0x150   : > { %vm347_vm7 = vweird.f32 %v341_v47 }
 0x151   : > { %v334_v53 = vmul.f32 2.0, %v330_v50  ;;  %v354_v61 = vor.u32 1.1754944e-38, %v353_v56  ;;  %vm352_vm9 = vcmp.eq.f32.partialorder %v351_v39, 8.507059e+37 }
 0x153   : > { %v335_v57 = vadd.f32 0.0009, %v334_v53 }
 0x155   : > { %v542_v51 = vpop.eup %541  ;;  %v336_v62 = vmul.f32 %v335_v57, %v333_v59 }
 0x156   : > { %v343_v54 = vmul.f32 %v542_v51, %v341_v47  ;;  %vm348_vm6 = vweird.f32 %v542_v51 }
 0x157   : > { %vm349_vm8 = vmor %vm347_vm7, %vm348_vm6 }
 0x158   : > { %v344_v55 = vsub.f32 1.0, %v343_v54 }
 0x15a   : > { %v345_v58 = vmul.f32 %v542_v51, %v344_v55 }
 0x15c   : > { %v346_v60 = vadd.f32 %v542_v51, %v345_v58 }
 0x15e   : > { %v350_v63 = vsel %vm349_vm8, %v542_v51, %v346_v60 }
 0x15f   : > { %v355_v0 = vsel %vm352_vm9, %v354_v61, %v350_v63 }
 0x160   : > { %v356_v1 = vmul.f32 %v355_v0, %v336_v62 }
 0x162   : > { %v357_v2 = vsub.f32 1.0, %v356_v1 }
 0x164   : > { %v358_v3 = vmul.f32 0.5, %v357_v2 }
 0x166   : > { %v359_v4 = vmax.f32 %v358_v3, 0.0 }
 0x168   : > { %v360_v5 = vmin.f32 %v359_v4, 1.0 }
 0x16a   : > { %361 = vst [vmem:[%s199_s29] sm:$0xff] %v360_v5 }
 0x16b   : > { %630 = shalt.err (!%p627_p0)
}
 0x16c   : > { %490 = dma.vmem_to_hbm [thread:$0]  (%p744_p11), %s376_s3, 128, %s378_s5, %s363_s19  }
 0x16d PF: > { %s389_s23 = sand.u32 1, %s661_s9   ;;  %p947_p1 = scmp.ge.s32.totalorder %s673_s12, 2 }
 0x16e   : > { %s390_s30 = scalar_lea.sflag [#allocation4], %s389_s23 }
 0x16f   : > { %p500_p4 = pnand %p947_p1, %p748_p12 }
 0x171   : > { %p501_p7 = pneg %p500_p4 }
 0x173   : > { %656 = dma.done.wait (%p501_p7), %s390_s30, 128  }
 0x174   : > { %658 = vsyncadd (%p501_p7), %s390_s30, 4294967168  ;;  %p18_p5 = scmp.ge.s32.totalorder %s719_s15, 4   ;;  %s948_s9 = smov %s665_s10 }
 0x175   : > { %s949_s10 = smov %s669_s11  ;;  %s950_s11 = smov %s731_s18 }
 0x176   : > { %s951_s12 = smov %s719_s15  ;;  %20 = sbr.rel (!%p18_p5) target bundleno = 7 (0x7), region = 86 }
 0x17b   :  { %396 = vsyncpa [#allocation3], 1 }
 0x17c   :  { %398 = vsyncpa [#allocation3 + $0x1], 1 }
 0x17d   :  { %399 = vsyncpa [#allocation6], 1 }
 0x17e   :  { %401 = vsyncpa [#allocation6 + $0x1], 1 }
 0x17f   :  { %402 = vsyncpa [#allocation4], 1 }
 0x180   :  { %404 = vsyncpa [#allocation4 + $0x1], 1 }

</bundles_post_ra>
